<compile_context>
chip_gen: v6e
topology: v6e:2x2x1
jax: 0.10.0
libtpu: 0.0.40
codegen_flags: <defaults>
</compile_context>

<pallas_src>
import functools

import jax
import jax.numpy as jnp
from jax.experimental import pallas as pl
from jax.experimental.pallas import tpu as pltpu

HIDDEN = 256
LANE = 128
SUBLANE = 8


def _round_up(x, m):
    return (x + m - 1) // m * m


def _actor_kernel(x_ref, w1_ref, w2_ref, w3_ref, b_ref, o_ref, *,
                  max_action, hidden, a_pad):
    # x tile: (TM, S_pad) f32. Weights are bf16; MXU accumulates in f32.
    x = x_ref[...].astype(jnp.bfloat16)

    h1 = jnp.dot(x, w1_ref[...], preferred_element_type=jnp.float32)
    h1 = jnp.maximum(h1 + b_ref[0:1, :hidden], 0.0)            # bias + ReLU (f32, VPU)

    h2 = jnp.dot(h1.astype(jnp.bfloat16), w2_ref[...],
                 preferred_element_type=jnp.float32)
    h2 = jnp.maximum(h2 + b_ref[1:2, :hidden], 0.0)

    h3 = jnp.dot(h2.astype(jnp.bfloat16), w3_ref[...],
                 preferred_element_type=jnp.float32)
    h3 = h3 + b_ref[2:3, :a_pad]

    # Lane-dense (TM, 128k) store; padding lanes hold tanh(0-weights+0-bias)=0-ish
    # garbage and are sliced off in the wrapper.
    o_ref[...] = (max_action * jnp.tanh(h3)).astype(o_ref.dtype)   # tanh (EUP)


def init_actor_params(key, state_dim, action_dim, hidden=HIDDEN):
    """nn.Linear-style U(-1/sqrt(fan_in), 1/sqrt(fan_in)) init.

    Weights stored as (in_features, out_features) (transpose of PyTorch's
    nn.Linear weight) so the kernel computes x @ W + b directly.
    """
    ks = jax.random.split(key, 6)

    def linear(kw, kb, fan_in, fan_out):
        bound = 1.0 / jnp.sqrt(float(fan_in))
        w = jax.random.uniform(kw, (fan_in, fan_out), jnp.float32, -bound, bound)
        b = jax.random.uniform(kb, (1, fan_out), jnp.float32, -bound, bound)
        return w, b

    w1, b1 = linear(ks[0], ks[1], state_dim, hidden)
    w2, b2 = linear(ks[2], ks[3], hidden, hidden)
    w3, b3 = linear(ks[4], ks[5], hidden, action_dim)
    return {"w1": w1, "b1": b1, "w2": w2, "b2": b2, "w3": w3, "b3": b3}


def pack_actor_params(params):
    """Pad weights to lane-friendly shapes, cast to bf16, pack biases into one slab."""
    w1, b1 = params["w1"], params["b1"]
    w2, b2 = params["w2"], params["b2"]
    w3, b3 = params["w3"], params["b3"]
    state_dim, hidden = w1.shape
    action_dim = w3.shape[1]

    s_pad = _round_up(max(state_dim, LANE), LANE)
    a_pad = _round_up(max(action_dim, LANE), LANE)
    bias_cols = max(hidden, a_pad)

    w1p = jnp.zeros((s_pad, hidden), jnp.bfloat16).at[:state_dim, :].set(
        w1.astype(jnp.bfloat16))
    w2p = w2.astype(jnp.bfloat16)
    w3p = jnp.zeros((hidden, a_pad), jnp.bfloat16).at[:, :action_dim].set(
        w3.astype(jnp.bfloat16))

    bias = jnp.zeros((3, bias_cols), jnp.float32)
    bias = bias.at[0, :hidden].set(b1.reshape(-1))
    bias = bias.at[1, :hidden].set(b2.reshape(-1))
    bias = bias.at[2, :action_dim].set(b3.reshape(-1))

    return {"w1": w1p, "w2": w2p, "w3": w3p, "bias": bias,
            "state_dim": state_dim, "action_dim": action_dim,
            "s_pad": s_pad, "a_pad": a_pad, "hidden": hidden}


def actor_forward(state, packed, max_action, *, block_rows=512):
    """Pallas forward pass. state: (B, state_dim) f32. Returns (B, action_dim) f32."""
    B, S = state.shape
    assert S == packed["state_dim"]
    s_pad = packed["s_pad"]
    a_pad = packed["a_pad"]
    hidden = packed["hidden"]
    action_dim = packed["action_dim"]

    # Batch tile: large (512) for throughput, shrunk for tiny batches.
    tm = min(block_rows, _round_up(B, SUBLANE))
    b_pad = _round_up(B, tm)
    grid = (b_pad // tm,)

    # Zero-pad rows (to tile multiple) and lanes (state_dim -> 128k).
    x = jnp.zeros((b_pad, s_pad), jnp.float32).at[:B, :S].set(
        state.astype(jnp.float32))

    kernel = functools.partial(_actor_kernel, max_action=float(max_action),
                               hidden=hidden, a_pad=a_pad)

    flops = 2 * B * (S * hidden + hidden * hidden + hidden * action_dim)
    bytes_accessed = (x.size * 4 + b_pad * a_pad * 4
                      + packed["w1"].size * 2 + packed["w2"].size * 2
                      + packed["w3"].size * 2 + packed["bias"].size * 4)
    cost = pl.CostEstimate(flops=flops, transcendentals=B * action_dim,
                           bytes_accessed=bytes_accessed)

    out = pl.pallas_call(
        kernel,
        out_shape=jax.ShapeDtypeStruct((b_pad, a_pad), jnp.float32),
        grid=grid,
        in_specs=[
            pl.BlockSpec((tm, s_pad), lambda i: (i, 0)),          # state tile
            pl.BlockSpec(packed["w1"].shape, lambda i: (0, 0)),   # VMEM-resident weights
            pl.BlockSpec(packed["w2"].shape, lambda i: (0, 0)),
            pl.BlockSpec(packed["w3"].shape, lambda i: (0, 0)),
            pl.BlockSpec(packed["bias"].shape, lambda i: (0, 0)),
        ],
        out_specs=pl.BlockSpec((tm, a_pad), lambda i: (i, 0)),
        compiler_params=pltpu.CompilerParams(
            dimension_semantics=("parallel",)),
        cost_estimate=cost,
    )(x, packed["w1"], packed["w2"], packed["w3"], packed["bias"])

    return out[:B, :action_dim]


def actor_reference(state, params, max_action):
    """Pure-JAX reference mirroring the kernel's bf16-matmul / f32-accum numerics."""
    def mm(x, w):
        return jnp.dot(x.astype(jnp.bfloat16), w.astype(jnp.bfloat16),
                       preferred_element_type=jnp.float32)

    h1 = jax.nn.relu(mm(state, params["w1"]) + params["b1"])
    h2 = jax.nn.relu(mm(h1, params["w2"]) + params["b2"])
    return max_action * jnp.tanh(mm(h2, params["w3"]) + params["b3"])


if __name__ == "__main__":
    key = jax.random.PRNGKey(0)
    k_params, k_state = jax.random.split(key)

    batch, state_dim, action_dim = 4, 16, 8
    max_action = 2.0

    params = init_actor_params(k_params, state_dim, action_dim)
    packed = pack_actor_params(params)
    state = jax.random.normal(k_state, (batch, state_dim), jnp.float32)

    out = actor_forward(state, packed, max_action)
    out = jax.block_until_ready(out)

    ref = actor_reference(state, params, max_action)
    assert out.shape == (batch, action_dim)
    assert jnp.allclose(out, ref, atol=1e-2, rtol=1e-2), (
        float(jnp.max(jnp.abs(out - ref))))

    print("KERNEL_OK")
</pallas_src>

<mosaic_0001>
module attributes {stable_mosaic.version = 11 : i64} {
  func.func @_actor_kernel(%arg0: i32, %arg1: memref<8x128xf32, #tpu.memory_space<vmem>>, %arg2: memref<128x256xbf16, #tpu.memory_space<vmem>>, %arg3: memref<256x256xbf16, #tpu.memory_space<vmem>>, %arg4: memref<256x128xbf16, #tpu.memory_space<vmem>>, %arg5: memref<3x256xf32, #tpu.memory_space<vmem>>, %arg6: memref<8x128xf32, #tpu.memory_space<vmem>>) attributes {dimension_semantics = [#tpu.dimension_semantics<parallel>], iteration_bounds = array<i64: 1>, scalar_prefetch = 0 : i64, scratch_operands = 0 : i64, tpu.core_type = #tpu.core_type<tc>, window_params = [{transform_indices = @transform_0, window_bounds = array<i64: 8, 128>}, {pipeline_mode = #tpu.pipeline_mode<synchronous>, transform_indices = @transform_1, window_bounds = array<i64: 128, 256>}, {pipeline_mode = #tpu.pipeline_mode<synchronous>, transform_indices = @transform_2, window_bounds = array<i64: 256, 256>}, {pipeline_mode = #tpu.pipeline_mode<synchronous>, transform_indices = @transform_3, window_bounds = array<i64: 256, 128>}, {pipeline_mode = #tpu.pipeline_mode<synchronous>, transform_indices = @transform_4, window_bounds = array<i64: 3, 256>}, {transform_indices = @transform_5, window_bounds = array<i64: 8, 128>}]} {
    %c0 = arith.constant 0 : index
    %c0_0 = arith.constant 0 : index
    %0 = vector.load %arg1[%c0, %c0_0] : memref<8x128xf32, #tpu.memory_space<vmem>>, vector<8x128xf32>
    %1 = arith.truncf %0 : vector<8x128xf32> to vector<8x128xbf16>
    %c0_1 = arith.constant 0 : index
    %c0_2 = arith.constant 0 : index
    %2 = vector.load %arg2[%c0_1, %c0_2] : memref<128x256xbf16, #tpu.memory_space<vmem>>, vector<128x256xbf16>
    %cst = arith.constant dense<0.000000e+00> : vector<8x256xf32>
    %3 = tpu.matmul %1, %2, %cst {dimension_numbers = #tpu.dot_dimension_numbers<[1], [0], [0], [1], [0, 0, 1, 1], [], []>} : vector<8x128xbf16>, vector<128x256xbf16>, vector<8x256xf32> -> vector<8x256xf32>
    %c0_3 = arith.constant 0 : index
    %c0_4 = arith.constant 0 : index
    %4 = vector.load %arg5[%c0_3, %c0_4] : memref<3x256xf32, #tpu.memory_space<vmem>>, vector<1x256xf32>
    %5 = vector.broadcast %4 : vector<1x256xf32> to vector<8x256xf32>
    %6 = arith.addf %3, %5 : vector<8x256xf32>
    %cst_5 = arith.constant 0.000000e+00 : f32
    %7 = vector.broadcast %cst_5 : f32 to vector<8x256xf32>
    %8 = arith.maximumf %6, %7 : vector<8x256xf32>
    %9 = arith.truncf %8 : vector<8x256xf32> to vector<8x256xbf16>
    %c0_6 = arith.constant 0 : index
    %c0_7 = arith.constant 0 : index
    %10 = vector.load %arg3[%c0_6, %c0_7] : memref<256x256xbf16, #tpu.memory_space<vmem>>, vector<256x256xbf16>
    %cst_8 = arith.constant dense<0.000000e+00> : vector<8x256xf32>
    %11 = tpu.matmul %9, %10, %cst_8 {dimension_numbers = #tpu.dot_dimension_numbers<[1], [0], [0], [1], [0, 0, 1, 1], [], []>} : vector<8x256xbf16>, vector<256x256xbf16>, vector<8x256xf32> -> vector<8x256xf32>
    %c1 = arith.constant 1 : index
    %c0_9 = arith.constant 0 : index
    %12 = vector.load %arg5[%c1, %c0_9] : memref<3x256xf32, #tpu.memory_space<vmem>>, vector<1x256xf32>
    %13 = vector.broadcast %12 : vector<1x256xf32> to vector<8x256xf32>
    %14 = arith.addf %11, %13 : vector<8x256xf32>
    %cst_10 = arith.constant 0.000000e+00 : f32
    %15 = vector.broadcast %cst_10 : f32 to vector<8x256xf32>
    %16 = arith.maximumf %14, %15 : vector<8x256xf32>
    %17 = arith.truncf %16 : vector<8x256xf32> to vector<8x256xbf16>
    %c0_11 = arith.constant 0 : index
    %c0_12 = arith.constant 0 : index
    %18 = vector.load %arg4[%c0_11, %c0_12] : memref<256x128xbf16, #tpu.memory_space<vmem>>, vector<256x128xbf16>
    %cst_13 = arith.constant dense<0.000000e+00> : vector<8x128xf32>
    %19 = tpu.matmul %17, %18, %cst_13 {dimension_numbers = #tpu.dot_dimension_numbers<[1], [0], [0], [1], [0, 0, 1, 1], [], []>} : vector<8x256xbf16>, vector<256x128xbf16>, vector<8x128xf32> -> vector<8x128xf32>
    %c2 = arith.constant 2 : index
    %c0_14 = arith.constant 0 : index
    %20 = vector.load %arg5[%c2, %c0_14] : memref<3x256xf32, #tpu.memory_space<vmem>>, vector<1x128xf32>
    %21 = vector.broadcast %20 : vector<1x128xf32> to vector<8x128xf32>
    %22 = arith.addf %19, %21 : vector<8x128xf32>
    %23 = math.tanh %22 : vector<8x128xf32>
    %cst_15 = arith.constant 2.000000e+00 : f32
    %24 = vector.broadcast %cst_15 : f32 to vector<8x128xf32>
    %25 = arith.mulf %24, %23 : vector<8x128xf32>
    %c0_16 = arith.constant 0 : index
    %c0_17 = arith.constant 0 : index
    %26 = vector.load %arg6[%c0_16, %c0_17] : memref<8x128xf32, #tpu.memory_space<vmem>>, vector<8x128xf32>
    tpu.vector_store %arg6[%c0_16, %c0_17], %25 {strides = array<i32>} : memref<8x128xf32, #tpu.memory_space<vmem>>, vector<8x128xf32>,
    return
  }
  func.func @transform_0(%arg0: i32) -> (i32, i32) {
    %c0_i32 = arith.constant 0 : i32
    %c0_i32_0 = arith.constant 0 : i32
    return %arg0, %c0_i32 : i32, i32
  }
  func.func @transform_1(%arg0: i32) -> (i32, i32) {
    %c0_i32 = arith.constant 0 : i32
    %c0_i32_0 = arith.constant 0 : i32
    %c0_i32_1 = arith.constant 0 : i32
    return %c0_i32, %c0_i32_0 : i32, i32
  }
  func.func @transform_2(%arg0: i32) -> (i32, i32) {
    %c0_i32 = arith.constant 0 : i32
    %c0_i32_0 = arith.constant 0 : i32
    %c0_i32_1 = arith.constant 0 : i32
    return %c0_i32, %c0_i32_0 : i32, i32
  }
  func.func @transform_3(%arg0: i32) -> (i32, i32) {
    %c0_i32 = arith.constant 0 : i32
    %c0_i32_0 = arith.constant 0 : i32
    %c0_i32_1 = arith.constant 0 : i32
    return %c0_i32, %c0_i32_0 : i32, i32
  }
  func.func @transform_4(%arg0: i32) -> (i32, i32) {
    %c0_i32 = arith.constant 0 : i32
    %c0_i32_0 = arith.constant 0 : i32
    %c0_i32_1 = arith.constant 0 : i32
    return %c0_i32, %c0_i32_0 : i32, i32
  }
  func.func @transform_5(%arg0: i32) -> (i32, i32) {
    %c0_i32 = arith.constant 0 : i32
    %c0_i32_0 = arith.constant 0 : i32
    return %arg0, %c0_i32 : i32, i32
  }
}

</mosaic_0001>

<bundles_post_ra>
// kernel: tpu_custom_call.1
= control target key start
LH: loop header
LB: loop body
LE: loop exit
PB: predicated region body
PF: predicated region fallthrough
CT: control target
= control target key end

     0   :  { %10 = vsyncpa [#allocation3], 0  ;;  %s1065_s0 = inlined_call_operand.hbm [shape: f32[8,128], index: 0, kind: input, shape index: {}]   ;;  %s1066_s1 = inlined_call_operand.hbm [shape: bf16[128,256], index: 1, kind: input, shape index: {}]   ;;  %s1067_s2 = inlined_call_operand.hbm [shape: bf16[256,256], index: 2, kind: input, shape index: {}]   ;;  %s1068_s3 = inlined_call_operand.hbm [shape: bf16[256,128], index: 3, kind: input, shape index: {}]   ;;  %s1069_s4 = inlined_call_operand.hbm [shape: f32[3,256], index: 4, kind: input, shape index: {}]   ;;  %s1070_s5 = inlined_call_operand.hbm [shape: f32[8,128], index: 5, kind: output, shape index: {}]  }
   0x1   :  { %11 = vsyncpa [#allocation6], 0 }
   0x2   :  { %12 = vsyncpa [#allocation9], 0 }
   0x3   :  { %13 = vsyncpa [#allocation4], 0  ;;  %s1000_s18 = smov [#allocation5]  }
   0x4   :  { %s29_s19 = sshll.u32 %s1000_s18, 4  ;;  %s30_s19 = int_to_ptr.vmem [resolvable:$true] %s29_s19 }
   0x5   :  { %s880_s20 = scalar_lea.vmem %s30_s19, 2048  ;;  %p885_p1 = scmp.lt.s32.totalorder %s30_s19, %s30_s19 }
   0x6   :  { %p881_p0 = scmp.ne.s32.totalorder %s30_s19, %s880_s20  ;;  %p886_p2 = scmp.lt.s32.totalorder %s880_s20, %s880_s20 }
   0x8   :  { %p887_p3 = por %p886_p2, %p885_p1 }
   0xa   :  { %p888_p4 = pnand %p887_p3, %p881_p0 }
   0xc   :  { %891 = shalt.err (!%p888_p4)
}
   0xd   :  { %s1001_s21 = smov 128   ;;  %s1002_s22 = smov 8  }
   0xe   :  { %35 = dma.hbm_to_vmem [thread:$0]  %s1066_s1, 2048, %s30_s19, [#allocation6], %s1001_s21, %s1001_s21, %s1002_s22  }
   0xf   :  { %s1003_s25 = smov [#allocation8]  }
  0x10   :  { %s53_s26 = sshll.u32 %s1003_s25, 4  ;;  %s54_s26 = int_to_ptr.vmem [resolvable:$true] %s53_s26 }
  0x11   :  { %s900_s27 = scalar_lea.vmem %s54_s26, 2048  ;;  %p905_p6 = scmp.lt.s32.totalorder %s54_s26, %s54_s26 }
  0x12   :  { %p901_p5 = scmp.ne.s32.totalorder %s54_s26, %s900_s27  ;;  %p906_p7 = scmp.lt.s32.totalorder %s900_s27, %s900_s27 }
  0x14   :  { %p907_p8 = por %p906_p7, %p905_p6 }
  0x16   :  { %p908_p9 = pnand %p907_p8, %p901_p5 }
  0x18   :  { %911 = shalt.err (!%p908_p9)
}
  0x19   :  { %s1004_s28 = smov 64   ;;  %s1005_s29 = smov 4  }
  0x1a   :  { %59 = dma.hbm_to_vmem [thread:$0]  %s1068_s3, 2048, %s54_s26, [#allocation9], %s1004_s28, %s1004_s28, %s1005_s29  }
  0x1b   :  { %s1006_s7 = smov [#allocation2]   ;;  %s1007_s9 = smov [#allocation7]  }
  0x1c   :  { %s20_s8 = sshll.u32 %s1006_s7, 4  ;;  %s41_s1 = sshll.u32 %s1007_s9, 4  ;;  %s21_s8 = int_to_ptr.vmem [resolvable:$true] %s20_s8  ;;  %s42_s1 = int_to_ptr.vmem [resolvable:$true] %s41_s1 }
  0x1d   :  { %s920_s10 = scalar_lea.vmem %s21_s8, 128  ;;  %p925_p11 = scmp.lt.s32.totalorder %s21_s8, %s21_s8 }
  0x1e   :  { %p921_p10 = scmp.ne.s32.totalorder %s21_s8, %s920_s10  ;;  %p926_p12 = scmp.lt.s32.totalorder %s920_s10, %s920_s10 }
  0x20   :  { %p927_p13 = por %p926_p12, %p925_p11 }
  0x22   :  { %p928_p0 = pnand %p927_p13, %p921_p10 }
  0x24   :  { %931 = shalt.err (!%p928_p0)
}
  0x25   :  { %23 = dma.hbm_to_vmem [thread:$0]  %s1065_s0, 128, %s21_s8, [#allocation3]  }
  0x26   :  { %s940_s13 = scalar_lea.vmem %s42_s1, 4096  ;;  %p945_p2 = scmp.lt.s32.totalorder %s42_s1, %s42_s1 }
  0x27   :  { %p941_p1 = scmp.ne.s32.totalorder %s42_s1, %s940_s13  ;;  %p946_p3 = scmp.lt.s32.totalorder %s940_s13, %s940_s13 }
  0x29   :  { %p947_p4 = por %p946_p3, %p945_p2 }
  0x2b   :  { %p948_p5 = pnand %p947_p4, %p941_p1 }
  0x2d   :  { %951 = shalt.err (!%p948_p5)
}
  0x2e   :  { %47 = dma.hbm_to_vmem [thread:$0]  %s1067_s2, 4096, %s42_s1, [#allocation6], %s1001_s21, %s1001_s21, %s1002_s22  }
  0x2f   :  { %s1008_s15 = smov [#allocation10]  }
  0x30   :  { %s66_s16 = sshll.u32 %s1008_s15, 4  ;;  %s67_s16 = int_to_ptr.vmem [resolvable:$true] %s66_s16 }
  0x31   :  { %s960_s17 = scalar_lea.vmem %s67_s16, 128  ;;  %p965_p7 = scmp.lt.s32.totalorder %s67_s16, %s67_s16 }
  0x32   :  { %p961_p6 = scmp.ne.s32.totalorder %s67_s16, %s960_s17  ;;  %p966_p8 = scmp.lt.s32.totalorder %s960_s17, %s960_s17 }
  0x34   :  { %p967_p9 = por %p966_p8, %p965_p7 }
  0x36   :  { %p968_p10 = pnand %p967_p9, %p961_p6 }
  0x38   :  { %971 = shalt.err (!%p968_p10)
}
  0x39   :  { %69 = dma.hbm_to_vmem [thread:$0]  %s1069_s4, 128, %s67_s16, [#allocation9]  }
  0x3a   :  { %992 = dma.done.wait [#allocation3], 128  }
  0x3b   :  { %993 = vsyncadd [#allocation3], 4294967168 }
  0x3c   :  { %994 = dma.done.wait [#allocation6], 6144  }
  0x3d   :  { %995 = vsyncadd [#allocation6], 4294961152 }
  0x3e   :  { %996 = dma.done.wait [#allocation9], 2176  }
  0x3f   :  { %997 = vsyncadd [#allocation9], 4294965120  ;;  %v1009_v0 = vmov 0   ;;  %v782_v1 = vld [vmem:[#allocation5 + $0x74] ss:$8 sps:$4 sm:$0xff]   ;;  %v858_v55 = vld [vmem:[#allocation8 + $0x68] sm:$0xff]   ;;  %v106_v63 = vlaneseq }
  0x40   :  { %228 = vmatprep.mubr.bf16.mxu0 %v1009_v0  ;;  %v784_v2 = vld [vmem:[#allocation5 + $0x70] ss:$8 sps:$4 sm:$0xff]   ;;  %196 = vmatprep.subr.bf16.mxu0 %v782_v1  ;;  %v785_v3 = vld [vmem:[#allocation5 + $0x64] ss:$8 sps:$4 sm:$0xff]   ;;  %v787_v4 = vld [vmem:[#allocation5 + $0x60] ss:$8 sps:$4 sm:$0xff]  }
  0x41   :  { %197 = vmatpush1.bf16.msra.mxu0 %v784_v2  ;;  %v788_v5 = vld [vmem:[#allocation5 + $0x54] ss:$8 sps:$4 sm:$0xff]   ;;  %v790_v6 = vld [vmem:[#allocation5 + $0x50] ss:$8 sps:$4 sm:$0xff]   ;;  %v791_v7 = vld [vmem:[#allocation5 + $0x44] ss:$8 sps:$4 sm:$0xff]  }
  0x42   :  { %198 = vmatprep.subr.bf16.mxu0 %v785_v3  ;;  %v793_v8 = vld [vmem:[#allocation5 + $0x40] ss:$8 sps:$4 sm:$0xff]   ;;  %v794_v9 = vld [vmem:[#allocation5 + $0x34] ss:$8 sps:$4 sm:$0xff]   ;;  %v808_v11 = vld [vmem:[#allocation7 + $0x70] ss:$8 sps:$4 sm:$0xff]  }
  0x43   :  { %v806_v10 = vld [vmem:[#allocation7 + $0x74] ss:$8 sps:$4 sm:$0xff]   ;;  %v809_v12 = vld [vmem:[#allocation7 + $0x64] ss:$8 sps:$4 sm:$0xff]   ;;  %v796_v13 = vld [vmem:[#allocation5 + $0x30] ss:$8 sps:$4 sm:$0xff]  }
  0x44   :  { %446 = vmatprep.subr.bf16.mxu1 %v806_v10  ;;  %v811_v14 = vld [vmem:[#allocation7 + $0x60] ss:$8 sps:$4 sm:$0xff]   ;;  %v812_v15 = vld [vmem:[#allocation7 + $0x54] ss:$8 sps:$4 sm:$0xff]   ;;  %v797_v16 = vld [vmem:[#allocation5 + $0x24] ss:$8 sps:$4 sm:$0xff]  }
  0x45   :  { %199 = vmatpush1.bf16.msra.mxu0 %v787_v4  ;;  %447 = vmatpush1.bf16.msra.mxu1 %v808_v11  ;;  %v799_v17 = vld [vmem:[#allocation5 + $0x20] ss:$8 sps:$4 sm:$0xff]   ;;  %v814_v18 = vld [vmem:[#allocation7 + $0x50] ss:$8 sps:$4 sm:$0xff]   ;;  %v815_v19 = vld [vmem:[#allocation7 + $0x44] ss:$8 sps:$4 sm:$0xff]  }
  0x46   :  { %200 = vmatprep.subr.bf16.mxu0 %v788_v5  ;;  %448 = vmatprep.subr.bf16.mxu1 %v809_v12  ;;  %v800_v20 = vld [vmem:[#allocation5 + $0x14] ss:$8 sps:$4 sm:$0xff]   ;;  %v802_v21 = vld [vmem:[#allocation5 + $0x10] ss:$8 sps:$4 sm:$0xff]   ;;  %v817_v22 = vld [vmem:[#allocation7 + $0x40] ss:$8 sps:$4 sm:$0xff]  }
  0x47   :  { %v818_v23 = vld [vmem:[#allocation7 + $0x34] ss:$8 sps:$4 sm:$0xff]   ;;  %v803_v24 = vld [vmem:[#allocation5 + $0x4] ss:$8 sps:$4 sm:$0xff]   ;;  %v805_v25 = vld [vmem:[#allocation5] ss:$8 sps:$4 sm:$0xff]  }
  0x48   :  { %v86_v26 = vld [vmem:[#allocation2] sm:$0xff]  ;;  %v821_v28 = vld [vmem:[#allocation7 + $0x24] ss:$8 sps:$4 sm:$0xff]   ;;  %v823_v29 = vld [vmem:[#allocation7 + $0x20] ss:$8 sps:$4 sm:$0xff]   ;;  %v107_v0 = vshrl.u32 %v106_v63, 7 }
  0x49   :  { %201 = vmatpush1.bf16.msra.mxu0 %v790_v6  ;;  %449 = vmatpush1.bf16.msra.mxu1 %v811_v14  ;;  %v820_v27 = vld [vmem:[#allocation7 + $0x30] ss:$8 sps:$4 sm:$0xff]   ;;  %v87_v30 = vpack.c.bf16 %v86_v26, %v86_v26  ;;  %v824_v31 = vld [vmem:[#allocation7 + $0x14] ss:$8 sps:$4 sm:$0xff]   ;;  %v827_v33 = vld [vmem:[#allocation7 + $0x4] ss:$8 sps:$4 sm:$0xff]  }
  0x4a   :  { %202 = vmatprep.subr.bf16.mxu0 %v791_v7  ;;  %450 = vmatprep.subr.bf16.mxu1 %v812_v15  ;;  %v826_v32 = vld [vmem:[#allocation7 + $0x10] ss:$8 sps:$4 sm:$0xff]   ;;  %v829_v34 = vld [vmem:[#allocation7] ss:$8 sps:$4 sm:$0xff]   ;;  %v830_v35 = vld [vmem:[#allocation7 + $0xf4] ss:$8 sps:$4 sm:$0xff]  }
  0x4b   :  { %v832_v36 = vld [vmem:[#allocation7 + $0xf0] ss:$8 sps:$4 sm:$0xff]   ;;  %v833_v37 = vld [vmem:[#allocation7 + $0xe4] ss:$8 sps:$4 sm:$0xff]   ;;  %v835_v38 = vld [vmem:[#allocation7 + $0xe0] ss:$8 sps:$4 sm:$0xff]  }
  0x4c   :  { %v836_v39 = vld [vmem:[#allocation7 + $0xd4] ss:$8 sps:$4 sm:$0xff]   ;;  %v838_v40 = vld [vmem:[#allocation7 + $0xd0] ss:$8 sps:$4 sm:$0xff]   ;;  %v839_v41 = vld [vmem:[#allocation7 + $0xc4] ss:$8 sps:$4 sm:$0xff]  }
  0x4d   :  { %203 = vmatpush1.bf16.msra.mxu0 %v793_v8  ;;  %451 = vmatpush1.bf16.msra.mxu1 %v814_v18  ;;  %v841_v42 = vld [vmem:[#allocation7 + $0xc0] ss:$8 sps:$4 sm:$0xff]   ;;  %v842_v43 = vld [vmem:[#allocation7 + $0xb4] ss:$8 sps:$4 sm:$0xff]   ;;  %v844_v44 = vld [vmem:[#allocation7 + $0xb0] ss:$8 sps:$4 sm:$0xff]  }
  0x4e   :  { %204 = vmatprep.subr.bf16.mxu0 %v794_v9  ;;  %452 = vmatprep.subr.bf16.mxu1 %v815_v19  ;;  %v845_v45 = vld [vmem:[#allocation7 + $0xa4] ss:$8 sps:$4 sm:$0xff]   ;;  %v847_v46 = vld [vmem:[#allocation7 + $0xa0] ss:$8 sps:$4 sm:$0xff]   ;;  %v848_v47 = vld [vmem:[#allocation7 + $0x94] ss:$8 sps:$4 sm:$0xff]  }
  0x4f   :  { %v850_v48 = vld [vmem:[#allocation7 + $0x90] ss:$8 sps:$4 sm:$0xff]   ;;  %v851_v49 = vld [vmem:[#allocation7 + $0x84] ss:$8 sps:$4 sm:$0xff]   ;;  %v853_v50 = vld [vmem:[#allocation7 + $0x80] ss:$8 sps:$4 sm:$0xff]  }
  0x50   :  { %v854_v51 = vld [vmem:[#allocation8 + $0x78] sm:$0xff]   ;;  %v856_v53 = vld [vmem:[#allocation8 + $0x70] sm:$0xff]   ;;  %v859_v56 = vld [vmem:[#allocation8 + $0x28] sm:$0xff]   ;;  %v108_v1 = vsub.s32 0, %v107_v0  ;;  %v112_v3 = vsub.s32 1, %v107_v0  ;;  %s1010_s2 = smov [#allocation11]  }
  0x51   :  { %205 = vmatpush1.bf16.msra.mxu0 %v796_v13  ;;  %453 = vmatpush1.bf16.msra.mxu1 %v817_v22  ;;  %v855_v52 = vld [vmem:[#allocation8 + $0x38] sm:$0xff]   ;;  %v857_v54 = vld [vmem:[#allocation8 + $0x30] sm:$0xff]   ;;  %v860_v57 = vld [vmem:[#allocation8 + $0x60] sm:$0xff]   ;;  %s673_s4 = sshll.u32 %s1010_s2, 4  ;;  %s674_s4 = int_to_ptr.vmem [resolvable:$true] %s673_s4 }
  0x52   :  { %206 = vmatprep.subr.bf16.mxu0 %v797_v16  ;;  %454 = vmatprep.subr.bf16.mxu1 %v818_v23  ;;  %v861_v58 = vld [vmem:[#allocation8 + $0x20] sm:$0xff]   ;;  %v862_v59 = vld [vmem:[#allocation8 + $0x58] sm:$0xff]   ;;  %v864_v61 = vld [vmem:[#allocation8 + $0x50] sm:$0xff]   ;;  %s972_s19 = scalar_lea.vmem %s674_s4, 128  ;;  %p977_p12 = scmp.lt.s32.totalorder %s674_s4, %s674_s4 }
  0x53   :  { %v863_v60 = vld [vmem:[#allocation8 + $0x18] sm:$0xff]   ;;  %v865_v62 = vld [vmem:[#allocation8 + $0x10] sm:$0xff]   ;;  %v104_v2 = vld [vmem:[#allocation10] ss:$4 sm:$0x3]  ;;  %p973_p11 = scmp.ne.s32.totalorder %s674_s4, %s972_s19  ;;  %p978_p13 = scmp.lt.s32.totalorder %s972_s19, %s972_s19 }
  0x54   :  { %v109_v4 = vrot.slane %v104_v2, %v108_v1  ;;  %v113_v5 = vrot.slane %v104_v2, %v112_v3  ;;  %v866_v16 = vld [vmem:[#allocation8 + $0x48] sm:$0xff]   ;;  %v868_v18 = vld [vmem:[#allocation8 + $0x40] sm:$0xff]  }
  0x55   :  { %207 = vmatpush1.bf16.msra.mxu0 %v799_v17  ;;  %455 = vmatpush1.bf16.msra.mxu1 %v820_v27  ;;  %v867_v17 = vld [vmem:[#allocation8 + $0x8] sm:$0xff]   ;;  %v869_v19 = vld [vmem:[#allocation8] sm:$0xff]   ;;  %p979_p0 = por %p978_p13, %p977_p12 }
  0x56   :  { %208 = vmatprep.subr.bf16.mxu0 %v800_v20  ;;  %456 = vmatprep.subr.bf16.mxu1 %v821_v28  ;;  %v274_v20 = vld [vmem:[#allocation10 + $0x1] ss:$4 sm:$0x3] }
  0x57   :  { %v283_v22 = vrot.slane %v274_v20, %v112_v3  ;;  %p980_p1 = pnand %p979_p0, %p973_p11 }
  0x59   :  { %209 = vmatpush1.bf16.msra.mxu0 %v802_v21  ;;  %457 = vmatpush1.bf16.msra.mxu1 %v823_v29  ;;  %v279_v21 = vrot.slane %v274_v20, %v108_v1 }
  0x5a   :  { %210 = vmatprep.subr.bf16.mxu0 %v803_v24  ;;  %458 = vmatprep.subr.bf16.mxu1 %v824_v31 }
  0x5d   :  { %211 = vmatpush1.bf16.msra.mxu0 %v805_v25  ;;  %459 = vmatpush1.bf16.msra.mxu1 %v826_v32 }
  0x5e   :  { %460 = vmatprep.subr.bf16.mxu1 %v827_v33  ;;  %749 = vmatprep.subr.bf16.mxu0 %v854_v51 }
  0x60   :  { %229 = vmatmul.mubr.bf16.vlgmr.msra.gmra.mxu0 %v87_v30 }
  0x61   :  { %461 = vmatpush1.bf16.msra.mxu1 %v829_v34  ;;  %750 = vmatpush3.bf16.msra.mxu0 %v855_v52  ;;  %v732_v34 = vld [vmem:[#allocation10 + $0x2] ss:$0 sm:$0xff] }
  0x62   :  { %462 = vmatprep.subr.bf16.mxu1 %v830_v35  ;;  %751 = vmatprep.subr.bf16.mxu0 %v856_v53 }
  0x65   :  { %463 = vmatpush2.bf16.msra.mxu1 %v832_v36  ;;  %752 = vmatpush3.bf16.msra.mxu0 %v857_v54 }
  0x66   :  { %464 = vmatprep.subr.bf16.mxu1 %v833_v37  ;;  %753 = vmatprep.subr.bf16.mxu0 %v858_v55 }
  0x69   :  { %465 = vmatpush2.bf16.msra.mxu1 %v835_v38  ;;  %754 = vmatpush3.bf16.msra.mxu0 %v859_v56 }
  0x6a   :  { %466 = vmatprep.subr.bf16.mxu1 %v836_v39  ;;  %755 = vmatprep.subr.bf16.mxu0 %v860_v57 }
  0x6d   :  { %467 = vmatpush2.bf16.msra.mxu1 %v838_v40  ;;  %756 = vmatpush3.bf16.msra.mxu0 %v861_v58 }
  0x6e   :  { %468 = vmatprep.subr.bf16.mxu1 %v839_v41  ;;  %757 = vmatprep.subr.bf16.mxu0 %v862_v59 }
  0x71   :  { %469 = vmatpush2.bf16.msra.mxu1 %v841_v42  ;;  %758 = vmatpush3.bf16.msra.mxu0 %v863_v60 }
  0x72   :  { %470 = vmatprep.subr.bf16.mxu1 %v842_v43  ;;  %759 = vmatprep.subr.bf16.mxu0 %v864_v61 }
  0x75   :  { %471 = vmatpush2.bf16.msra.mxu1 %v844_v44  ;;  %760 = vmatpush3.bf16.msra.mxu0 %v865_v62 }
  0x76   :  { %472 = vmatprep.subr.bf16.mxu1 %v845_v45  ;;  %761 = vmatprep.subr.bf16.mxu0 %v866_v16 }
  0x79   :  { %473 = vmatpush2.bf16.msra.mxu1 %v847_v46  ;;  %762 = vmatpush3.bf16.msra.mxu0 %v867_v17 }
  0x7a   :  { %474 = vmatprep.subr.bf16.mxu1 %v848_v47  ;;  %763 = vmatprep.subr.bf16.mxu0 %v868_v18 }
  0x7d   :  { %475 = vmatpush2.bf16.msra.mxu1 %v850_v48  ;;  %764 = vmatpush3.bf16.msra.mxu0 %v869_v19 }
  0x7e   :  { %476 = vmatprep.subr.bf16.mxu1 %v851_v49 }
  0x81   :  { %477 = vmatpush2.bf16.msra.mxu1 %v853_v50 }
 0x120   :  { %v230_v6 = vpop.f32.mrf.mxu0 }
 0x121   :  { %v231_v7 = vadd.f32 %v230_v6, %v109_v4 }
 0x122   :  { %v232_v8 = vpop.f32.mrf.mxu0 }
 0x123   :  { %v233_v9 = vadd.f32 %v232_v8, %v113_v5  ;;  %v237_v10 = vmax.f32 %v231_v7, 0.0 }
 0x124   :  { %v234_v11 = vpop.f32.mrf.mxu0 }
 0x125   :  { %v238_v12 = vmax.f32 %v233_v9, 0.0  ;;  %v239_v15 = vpack.c.bf16 %v237_v10, %v237_v10 }
 0x126   :  { %v235_v13 = vpop.f32.mrf.mxu0 }
 0x127   :  { %v240_v14 = vpack.c.bf16 %v238_v12, %v238_v12 }
 0x129   :  { %478 = vmatprep.mubr.bf16.mxu1 %v240_v14 }
 0x12a   :  { %479 = vmatmul.mubr.bf16.vlgmr.msra.gmra.mxu1 %v239_v15 }
 0x1ea   :  { %v480_v23 = vpop.f32.mrf.mxu1 }
 0x1eb   :  { %v481_v24 = vadd.f32 %v480_v23, %v279_v21 }
 0x1ec   :  { %v482_v25 = vpop.f32.mrf.mxu1 }
 0x1ed   :  { %v483_v26 = vadd.f32 %v482_v25, %v283_v22  ;;  %v487_v27 = vmax.f32 %v481_v24, 0.0 }
 0x1ee   :  { %v484_v28 = vpop.f32.mrf.mxu1 }
 0x1ef   :  { %v488_v29 = vmax.f32 %v483_v26, 0.0  ;;  %v489_v32 = vpack.c.bf16 %v487_v27, %v487_v27 }
 0x1f0   :  { %v485_v30 = vpop.f32.mrf.mxu1 }
 0x1f1   :  { %v490_v31 = vpack.c.bf16 %v488_v29, %v488_v29 }
 0x1f3   :  { %656 = vmatprep.mubr.bf16.mxu0 %v490_v31 }
 0x1f4   :  { %657 = vmatmul.mubr.bf16.vlgmr.msra.gmra.mxu0 %v489_v32 }
 0x2b4   :  { %v765_v33 = vpop.f32.mrf.mxu0 }
 0x2b6   :  { %v766_v35 = vpop.f32.mrf.mxu0 }
 0x2b7   :  { %v767_v36 = vadd.f32 %v766_v35, %v765_v33 }
 0x2b8   :  { %v768_v37 = vpop.f32.mrf.mxu0 }
 0x2b9   :  { %v659_v38 = vadd.f32 %v767_v36, %v732_v34 }
 0x2ba   :  { %v769_v39 = vpop.f32.mrf.mxu0 }
 0x2bb   :  { %870 = vtanh.f32 %v659_v38 }
 0x2c8   :  { %v871_v40 = vpop.eup %870 }
 0x2c9   :  { %v665_v41 = vmul.f32 2.0, %v871_v40 }
 0x2cb   :  { %666 = vst [vmem:[#allocation11] sm:$0xff] %v665_v41 }
 0x2cc   :  { %983 = shalt.err (!%p980_p1)
}
 0x2cd   :  { %676 = dma.vmem_to_hbm [thread:$0]  %s674_s4, 128, %s1070_s5, [#allocation4]  }
 0x2ce   :  { %998 = dma.done.wait [#allocation4], 128  }
 0x2cf   :  { %999 = vsyncadd [#allocation4], 4294967168 }
 0x2d0   :  { %680 = vsyncpa [#allocation3], 1 }
 0x2d1   :  { %681 = vsyncpa [#allocation6], 1 }
 0x2d2   :  { %682 = vsyncpa [#allocation9], 1 }
 0x2d3   :  { %683 = vsyncpa [#allocation4], 1 }

</bundles_post_ra>
